<compile_context>
chip_gen: v7x
topology: tpu7x:2x2x1
jax: 0.10.0
libtpu: 0.0.40
codegen_flags: <defaults>
</compile_context>

<pallas_src>
import functools
from typing import List, Optional

import jax
import jax.numpy as jnp
from jax.experimental import pallas as pl
from jax.experimental.pallas import tpu as pltpu


def _round_up(x: int, m: int) -> int:
    return ((x + m - 1) // m) * m


def _sublane_multiple(dtype) -> int:
    """Minimum sublane (second-minor) block multiple for a dtype on TPU."""
    itemsize = jnp.dtype(dtype).itemsize
    return 8 * max(1, 4 // itemsize)      # f32 -> 8, bf16 -> 16, int8/fp8 -> 32


def _mlp_kernel(*refs, n_layers: int, compute_dtype, precision):
    """refs = (x_ref, w0, b0, w1, b1, ..., w{L-1}, b{L-1}, out_ref)."""
    x_ref = refs[0]
    out_ref = refs[-1]
    param_refs = refs[1:-1]

    h = x_ref[...]
    if h.dtype != compute_dtype:
        h = h.astype(compute_dtype)

    for i in range(n_layers):
        w = param_refs[2 * i][...]        # compute_dtype (cast once in wrapper)
        b = param_refs[2 * i + 1][...]    # f32, (1, d_out): added to f32 accumulator
        h = jnp.dot(h, w, preferred_element_type=jnp.float32, precision=precision) + b
        if i < n_layers - 1:
            h = jnp.maximum(h, 0.0)       # ReLU between layers (not after last)
            if h.dtype != compute_dtype:
                h = h.astype(compute_dtype)
    out_ref[...] = h.astype(out_ref.dtype)


def multiheaded_mlp_forward(x, weights, biases, layer_sizes: List[int],
                            num_heads: int, *,
                            batch_tile: int = 2048,
                            compute_dtype=None,
                            out_dtype=None,
                            precision=None,
                            vmem_limit_bytes: Optional[int] = None):
    """Pallas forward pass equivalent to MultiHeadedMLP.forward.

    x:        [B, layer_sizes[0]]
    weights:  list of [d_in, d_out] arrays (last: [d, layer_sizes[-1]*num_heads])
    biases:   list of [d_out] arrays
    returns:  [B, layer_sizes[-1], num_heads]
    """
    B, d_in = x.shape
    assert d_in == layer_sizes[0]
    n_layers = len(weights)
    out_flat = layer_sizes[-1] * num_heads
    assert int(weights[-1].shape[1]) == out_flat

    compute_dtype = (jnp.dtype(compute_dtype) if compute_dtype is not None
                     else jnp.dtype(x.dtype))
    out_dtype = jnp.dtype(out_dtype) if out_dtype is not None else jnp.dtype(x.dtype)

    # --- batch tiling -------------------------------------------------------
    # Sublane multiple depends on the narrowest kernel-visible batch-tiled dtype.
    sub = max(_sublane_multiple(x.dtype), _sublane_multiple(out_dtype))
    bt = max(sub, _round_up(min(batch_tile, B), sub))
    # Prefer >= 2 grid steps when the batch allows it so v7x's two TensorCores
    # both get work (harmless ~0.35us extra on single-core v5e/v6e).
    if B > sub and pl.cdiv(B, bt) < 2:
        bt = max(sub, _round_up(pl.cdiv(B, 2), sub))
    grid = (pl.cdiv(B, bt),)   # ragged final block handled by Pallas; no wrapper pad

    # --- specs / params -----------------------------------------------------
    in_specs = [pl.BlockSpec((bt, d_in), lambda i: (i, 0))]
    params = []
    for w, b in zip(weights, biases):
        w = w.astype(compute_dtype)
        b2 = b.reshape(1, -1).astype(jnp.float32)
        params.append(w)
        params.append(b2)
        # Tiny full-array blocks, constant index_map -> resident across steps.
        in_specs.append(pl.BlockSpec(w.shape, lambda i: (0, 0)))
        in_specs.append(pl.BlockSpec(b2.shape, lambda i: (0, 0)))

    # --- advisory cost estimate for XLA scheduling --------------------------
    flops = 2 * B * sum(int(w.shape[0]) * int(w.shape[1]) for w in weights)
    param_bytes = sum(int(p.size) * jnp.dtype(p.dtype).itemsize for p in params)
    bytes_accessed = (int(x.size) * jnp.dtype(x.dtype).itemsize
                      + B * out_flat * out_dtype.itemsize
                      + param_bytes)
    cost = pl.CostEstimate(flops=flops, transcendentals=0,
                           bytes_accessed=bytes_accessed)

    # --- VMEM budget: only raise the scoped limit if the tiles demand it ----
    widest = max([d_in] + [int(w.shape[1]) for w in weights])
    vmem_est = (2 * bt * (d_in * jnp.dtype(x.dtype).itemsize
                          + out_flat * out_dtype.itemsize)   # double-buffered I/O
                + 2 * param_bytes                            # params (+ headroom)
                + 2 * bt * widest * 4)                       # f32 intermediates
    cp_kwargs = dict(dimension_semantics=("parallel",))
    if vmem_limit_bytes is None and vmem_est > 12 * 1024 * 1024:
        vmem_limit_bytes = min(int(vmem_est * 1.5), 100 * 1024 * 1024)
    if vmem_limit_bytes is not None:
        cp_kwargs["vmem_limit_bytes"] = int(vmem_limit_bytes)

    kernel = functools.partial(_mlp_kernel, n_layers=n_layers,
                               compute_dtype=compute_dtype, precision=precision)

    out = pl.pallas_call(
        kernel,
        out_shape=jax.ShapeDtypeStruct((B, out_flat), out_dtype),
        grid=grid,
        in_specs=in_specs,
        out_specs=pl.BlockSpec((bt, out_flat), lambda i: (i, 0)),
        compiler_params=pltpu.CompilerParams(**cp_kwargs),
        cost_estimate=cost,
    )(x, *params)

    # Same semantics as torch's x.view(*x.shape[:-1], layer_sizes[-1], -1):
    # head index is the fastest-varying dim of the final linear output.
    # (Consumers wanting a lane-friendly layout can use the flat [B, out_flat].)
    return out.reshape(B, layer_sizes[-1], num_heads)


def _init_params(key, layer_sizes: List[int], num_heads: int):
    """Deterministic init; mirrors torch.nn.Linear's U(-1/sqrt(fan_in), +) shapes."""
    dims_in = layer_sizes[:-1]
    dims_out = layer_sizes[1:-1] + [layer_sizes[-1] * num_heads]
    weights, biases = [], []
    for d_i, d_o in zip(dims_in, dims_out):
        key, kw, kb = jax.random.split(key, 3)
        bound = 1.0 / jnp.sqrt(jnp.float32(d_i))
        weights.append(jax.random.uniform(kw, (d_i, d_o), jnp.float32,
                                          minval=-bound, maxval=bound))
        biases.append(jax.random.uniform(kb, (d_o,), jnp.float32,
                                         minval=-bound, maxval=bound))
    return weights, biases


def _reference_forward(x, weights, biases, layer_sizes, num_heads):
    h = x
    for i, (w, b) in enumerate(zip(weights, biases)):
        h = h @ w + b
        if i < len(weights) - 1:
            h = jnp.maximum(h, 0.0)
    return h.reshape(h.shape[0], layer_sizes[-1], num_heads)


if __name__ == "__main__":
    layer_sizes = [8, 32, 32, 16]   # input, hidden, hidden, per-head output
    num_heads = 4

    key = jax.random.PRNGKey(0)
    key, kx = jax.random.split(key)
    weights, biases = _init_params(key, layer_sizes, num_heads)

    # 1) Small batch, pure f32 path: tight numerical check (grid forced to 2
    #    steps, exercising the multi-step / megacore-parallel path).
    B = 16
    x = jax.random.normal(kx, (B, layer_sizes[0]), jnp.float32)
    out = multiheaded_mlp_forward(x, weights, biases, layer_sizes, num_heads)
    out = jax.block_until_ready(out)
    ref = _reference_forward(x, weights, biases, layer_sizes, num_heads)
    assert out.shape == (B, layer_sizes[-1], num_heads)
    assert jnp.allclose(out, ref, atol=1e-5, rtol=1e-5)

    # 2) Ragged batch with bf16 MXU operands + bf16 output (halved param and
    #    output HBM bytes), f32 accumulation, >=2 grid steps, no wrapper pads:
    #    exercises the 16-row sublane multiple and the masked final block.
    B2 = 600
    key, kx2 = jax.random.split(key)
    x2 = jax.random.normal(kx2, (B2, layer_sizes[0]), jnp.float32)
    out2 = multiheaded_mlp_forward(x2, weights, biases, layer_sizes, num_heads,
                                   batch_tile=2048,
                                   compute_dtype=jnp.bfloat16,
                                   out_dtype=jnp.bfloat16)
    out2 = jax.block_until_ready(out2)
    ref2 = _reference_forward(x2, weights, biases, layer_sizes, num_heads)
    assert out2.shape == (B2, layer_sizes[-1], num_heads)
    assert jnp.allclose(out2.astype(jnp.float32), ref2, atol=1e-1, rtol=1e-1)

    print("KERNEL_OK")
</pallas_src>

<mosaic_0001>
module attributes {stable_mosaic.version = 11 : i64} {
  func.func @_mlp_kernel(%arg0: i32, %arg1: memref<8x8xf32, #tpu.memory_space<vmem>>, %arg2: memref<8x32xf32, #tpu.memory_space<vmem>>, %arg3: memref<1x32xf32, #tpu.memory_space<vmem>>, %arg4: memref<32x32xf32, #tpu.memory_space<vmem>>, %arg5: memref<1x32xf32, #tpu.memory_space<vmem>>, %arg6: memref<32x64xf32, #tpu.memory_space<vmem>>, %arg7: memref<1x64xf32, #tpu.memory_space<vmem>>, %arg8: memref<8x64xf32, #tpu.memory_space<vmem>>) attributes {dimension_semantics = [#tpu.dimension_semantics<parallel>], iteration_bounds = array<i64: 2>, scalar_prefetch = 0 : i64, scratch_operands = 0 : i64, tpu.core_type = #tpu.core_type<tc>, window_params = [{transform_indices = @transform_0, window_bounds = array<i64: 8, 8>}, {pipeline_mode = #tpu.pipeline_mode<synchronous>, transform_indices = @transform_1, window_bounds = array<i64: 8, 32>}, {pipeline_mode = #tpu.pipeline_mode<synchronous>, transform_indices = @transform_2, window_bounds = array<i64: 1, 32>}, {pipeline_mode = #tpu.pipeline_mode<synchronous>, transform_indices = @transform_3, window_bounds = array<i64: 32, 32>}, {pipeline_mode = #tpu.pipeline_mode<synchronous>, transform_indices = @transform_4, window_bounds = array<i64: 1, 32>}, {pipeline_mode = #tpu.pipeline_mode<synchronous>, transform_indices = @transform_5, window_bounds = array<i64: 32, 64>}, {pipeline_mode = #tpu.pipeline_mode<synchronous>, transform_indices = @transform_6, window_bounds = array<i64: 1, 64>}, {transform_indices = @transform_7, window_bounds = array<i64: 8, 64>}]} {
    %c0 = arith.constant 0 : index
    %c0_0 = arith.constant 0 : index
    %0 = vector.load %arg1[%c0, %c0_0] : memref<8x8xf32, #tpu.memory_space<vmem>>, vector<8x8xf32>
    %c0_1 = arith.constant 0 : index
    %c0_2 = arith.constant 0 : index
    %1 = vector.load %arg2[%c0_1, %c0_2] : memref<8x32xf32, #tpu.memory_space<vmem>>, vector<8x32xf32>
    %c0_3 = arith.constant 0 : index
    %c0_4 = arith.constant 0 : index
    %2 = vector.load %arg3[%c0_3, %c0_4] : memref<1x32xf32, #tpu.memory_space<vmem>>, vector<1x32xf32>
    %cst = arith.constant dense<0.000000e+00> : vector<8x32xf32>
    %3 = tpu.matmul %0, %1, %cst {dimension_numbers = #tpu.dot_dimension_numbers<[1], [0], [0], [1], [0, 0, 1, 1], [], []>} : vector<8x8xf32>, vector<8x32xf32>, vector<8x32xf32> -> vector<8x32xf32>
    %4 = vector.broadcast %2 : vector<1x32xf32> to vector<8x32xf32>
    %5 = arith.addf %3, %4 : vector<8x32xf32>
    %cst_5 = arith.constant 0.000000e+00 : f32
    %6 = vector.broadcast %cst_5 : f32 to vector<8x32xf32>
    %7 = arith.maximumf %5, %6 : vector<8x32xf32>
    %c0_6 = arith.constant 0 : index
    %c0_7 = arith.constant 0 : index
    %8 = vector.load %arg4[%c0_6, %c0_7] : memref<32x32xf32, #tpu.memory_space<vmem>>, vector<32x32xf32>
    %c0_8 = arith.constant 0 : index
    %c0_9 = arith.constant 0 : index
    %9 = vector.load %arg5[%c0_8, %c0_9] : memref<1x32xf32, #tpu.memory_space<vmem>>, vector<1x32xf32>
    %cst_10 = arith.constant dense<0.000000e+00> : vector<8x32xf32>
    %10 = tpu.matmul %7, %8, %cst_10 {dimension_numbers = #tpu.dot_dimension_numbers<[1], [0], [0], [1], [0, 0, 1, 1], [], []>} : vector<8x32xf32>, vector<32x32xf32>, vector<8x32xf32> -> vector<8x32xf32>
    %11 = vector.broadcast %9 : vector<1x32xf32> to vector<8x32xf32>
    %12 = arith.addf %10, %11 : vector<8x32xf32>
    %cst_11 = arith.constant 0.000000e+00 : f32
    %13 = vector.broadcast %cst_11 : f32 to vector<8x32xf32>
    %14 = arith.maximumf %12, %13 : vector<8x32xf32>
    %c0_12 = arith.constant 0 : index
    %c0_13 = arith.constant 0 : index
    %15 = vector.load %arg6[%c0_12, %c0_13] : memref<32x64xf32, #tpu.memory_space<vmem>>, vector<32x64xf32>
    %c0_14 = arith.constant 0 : index
    %c0_15 = arith.constant 0 : index
    %16 = vector.load %arg7[%c0_14, %c0_15] : memref<1x64xf32, #tpu.memory_space<vmem>>, vector<1x64xf32>
    %cst_16 = arith.constant dense<0.000000e+00> : vector<8x64xf32>
    %17 = tpu.matmul %14, %15, %cst_16 {dimension_numbers = #tpu.dot_dimension_numbers<[1], [0], [0], [1], [0, 0, 1, 1], [], []>} : vector<8x32xf32>, vector<32x64xf32>, vector<8x64xf32> -> vector<8x64xf32>
    %18 = vector.broadcast %16 : vector<1x64xf32> to vector<8x64xf32>
    %19 = arith.addf %17, %18 : vector<8x64xf32>
    %c0_17 = arith.constant 0 : index
    %c0_18 = arith.constant 0 : index
    %20 = vector.load %arg8[%c0_17, %c0_18] : memref<8x64xf32, #tpu.memory_space<vmem>>, vector<8x64xf32>
    tpu.vector_store %arg8[%c0_17, %c0_18], %19 {strides = array<i32>} : memref<8x64xf32, #tpu.memory_space<vmem>>, vector<8x64xf32>,
    return
  }
  func.func @transform_0(%arg0: i32) -> (i32, i32) {
    %c0_i32 = arith.constant 0 : i32
    %c0_i32_0 = arith.constant 0 : i32
    return %arg0, %c0_i32 : i32, i32
  }
  func.func @transform_1(%arg0: i32) -> (i32, i32) {
    %c0_i32 = arith.constant 0 : i32
    %c0_i32_0 = arith.constant 0 : i32
    %c0_i32_1 = arith.constant 0 : i32
    return %c0_i32, %c0_i32_0 : i32, i32
  }
  func.func @transform_2(%arg0: i32) -> (i32, i32) {
    %c0_i32 = arith.constant 0 : i32
    %c0_i32_0 = arith.constant 0 : i32
    %c0_i32_1 = arith.constant 0 : i32
    return %c0_i32, %c0_i32_0 : i32, i32
  }
  func.func @transform_3(%arg0: i32) -> (i32, i32) {
    %c0_i32 = arith.constant 0 : i32
    %c0_i32_0 = arith.constant 0 : i32
    %c0_i32_1 = arith.constant 0 : i32
    return %c0_i32, %c0_i32_0 : i32, i32
  }
  func.func @transform_4(%arg0: i32) -> (i32, i32) {
    %c0_i32 = arith.constant 0 : i32
    %c0_i32_0 = arith.constant 0 : i32
    %c0_i32_1 = arith.constant 0 : i32
    return %c0_i32, %c0_i32_0 : i32, i32
  }
  func.func @transform_5(%arg0: i32) -> (i32, i32) {
    %c0_i32 = arith.constant 0 : i32
    %c0_i32_0 = arith.constant 0 : i32
    %c0_i32_1 = arith.constant 0 : i32
    return %c0_i32, %c0_i32_0 : i32, i32
  }
  func.func @transform_6(%arg0: i32) -> (i32, i32) {
    %c0_i32 = arith.constant 0 : i32
    %c0_i32_0 = arith.constant 0 : i32
    %c0_i32_1 = arith.constant 0 : i32
    return %c0_i32, %c0_i32_0 : i32, i32
  }
  func.func @transform_7(%arg0: i32) -> (i32, i32) {
    %c0_i32 = arith.constant 0 : i32
    %c0_i32_0 = arith.constant 0 : i32
    return %arg0, %c0_i32 : i32, i32
  }
}

</mosaic_0001>

<bundles_post_ra>
// kernel: tpu_custom_call.1
= control target key start
LH: loop header
LB: loop body
LE: loop exit
PB: predicated region body
PF: predicated region fallthrough
CT: control target
= control target key end

     0   :  { %12 = vsyncpa [#allocation3], 0  ;;  %s1161_s0 = inlined_call_operand.vmem [shape: f32[16,8], index: 0, kind: input, shape index: {}]   ;;  %s1162_s1 = inlined_call_operand.hbm [shape: f32[8,32], index: 1, kind: input, shape index: {}]   ;;  %s1163_s2 = inlined_call_operand.vmem [shape: f32[1,32], index: 2, kind: input, shape index: {}]   ;;  %s1164_s3 = inlined_call_operand.vmem [shape: f32[32,32], index: 3, kind: input, shape index: {}]   ;;  %s1165_s4 = inlined_call_operand.vmem [shape: f32[1,32], index: 4, kind: input, shape index: {}]   ;;  %s1166_s5 = inlined_call_operand.hbm [shape: f32[32,64], index: 5, kind: input, shape index: {}]   ;;  %s1167_s6 = inlined_call_operand.vmem [shape: f32[1,64], index: 6, kind: input, shape index: {}]   ;;  %s1168_s7 = inlined_call_operand.hbm [shape: f32[16,64], index: 7, kind: output, shape index: {}]  }
   0x1   :  { %13 = vsyncpa [#allocation6], 0 }
   0x2   :  { %14 = vsyncpa [#allocation4], 0 }
   0x3   :  { %16 = vsyncpa [#allocation4 + $0x1], 0  ;;  %s965_s24 = smov 0   ;;  %s967_s25 = smov 0  }
   0x4   :  { %s969_s26 = smov 0   ;;  %s971_s27 = smov 0  }
   0x5 LB: > { %s986_s28 = sadd.s32 4294967295, %s915_s27   ;;  %s653_s29 = sadd.s32 4294967294, %s915_s27   ;;  %s915_s27 = sphi %s971_s27, %s1186_s27   ;;  %s911_s26 = sphi %s969_s26, %s1185_s26   ;;  %s907_s25 = sphi %s967_s25, %s1184_s25   ;;  %s903_s24 = sphi %s965_s24, %s1183_s24  }
   0x6   : > { %s990_s30 = sadd.s32 1, %s915_s27   ;;  %s181_s8 = sadd.s32 1, %s911_s26 }
   0x7   : > { %s178_s9 = ssub.s32 %s915_s27, %s990_s30  ;;  %p191_p0 = scmp.ne.s32.totalorder %s911_s26, %s907_s25 }
   0x8   : > { %p179_p1 = scmp.eq.s32.totalorder %s178_s9, 0  ;;  %p192_p2 = scmp.eq.s32.totalorder %s986_s28, 1 }
   0x9   : > { %p197_p3 = scmp.ne.s32.totalorder %s907_s25, %s903_s24  ;;  %p198_p4 = scmp.eq.s32.totalorder %s653_s29, 1 }
   0xa   : > { %s1001_s10 = scalar_select %p179_p1, %s911_s26, %s181_s8  }
   0xb   : > { %p1003_p5 = por %p192_p2, %p191_p0  ;;  %p1007_p6 = por %p198_p4, %p197_p3 }
   0xc   : > { %p654_p7 = scmp.ge.s32.totalorder %s915_s27, 1  ;;  %p205_p8 = scmp.lt.s32.totalorder %s915_s27, 3 }
   0xd   : > { %s1172_s11 = scalar_select %p1003_p5, 1, 0 }
   0xe   : > { %s1173_s12 = scalar_select %p1007_p6, 1, 0 }
   0xf   : > { %p1169_p9 = scmp.eq.s32.totalorder %s986_s28, 0  ;;  %p1014_p10 = pnand %p654_p7, %p205_p8 }
  0x10   : > { %s917_s14 = smov [#allocation2]   ;;  %s918_s16 = smov [#allocation5]  }
  0x11   : > { %s1174_s13 = scalar_select %p1014_p10, 1, 0 }
  0x12   : > { %s218_s15 = sshll.u32 %s917_s14, 4  ;;  %p734_p11 = pneg %p1014_p10  ;;  %s219_s15 = int_to_ptr.vmem [resolvable:$true] %s218_s15 }
  0x13   : > { %s237_s17 = sshll.u32 %s918_s16, 4  ;;  %s789_s21 = scalar_lea.hbm %s1162_s1, 128  ;;  %s1026_s17 = int_to_ptr.vmem [resolvable:$true] %s237_s17 }
  0x14   : > { %p1022_p12 = pnand %p1169_p9, %p734_p11  ;;  %p790_p13 = scmp.ne.s32.totalorder %s1162_s1, %s789_s21 }
  0x15   : > { %p796_p3 = scmp.lt.u32.totalorder %s789_s21, %s1162_s1 }
  0x16   : > { %p791_p0 = pneg %p1022_p12 }
  0x18   : > { %p792_p1 = pnand %p791_p0, %p790_p13 }
  0x1a   : > { %p793_p2 = pneg %p792_p1 }
  0x1c   : > { %p798_p4 = pnand %p796_p3, %p793_p2 }
  0x1e   : > { %801 = shalt.err (!%p798_p4)
}
  0x1f   : > { %s802_s9 = scalar_lea.vmem %s219_s15, 128  ;;  %p810_p9 = scmp.lt.s32.totalorder %s219_s15, %s219_s15 }
  0x20   : > { %p803_p7 = scmp.ne.s32.totalorder %s219_s15, %s802_s9  ;;  %p811_p6 = scmp.lt.s32.totalorder %s802_s9, %s802_s9 }
  0x22   : > { %p805_p8 = pnand %p803_p7, %p791_p0  ;;  %p812_p5 = por %p811_p6, %p810_p9 }
  0x24   : > { %p806_p11 = pneg %p805_p8 }
  0x26   : > { %p813_p10 = pnand %p812_p5, %p806_p11 }
  0x28   : > { %816 = shalt.err (!%p813_p10)
}
  0x29   : > { %737 = dma.hbm_to_vmem [thread:$0]  (!%p1022_p12), %s1162_s1, 128, %s219_s15, [#allocation3]  }
  0x2a   : > { %s817_s21 = scalar_lea.hbm %s1166_s5, 512 }
  0x2b   : > { %p818_p13 = scmp.ne.s32.totalorder %s1166_s5, %s817_s21  ;;  %p824_p9 = scmp.lt.u32.totalorder %s817_s21, %s1166_s5 }
  0x2d   : > { %p820_p6 = pnand %p818_p13, %p791_p0 }
  0x2f   : > { %p821_p5 = pneg %p820_p6 }
  0x31   : > { %p826_p10 = pnand %p824_p9, %p821_p5 }
  0x33   : > { %829 = shalt.err (!%p826_p10)
}
  0x34   : > { %s830_s15 = scalar_lea.vmem %s1026_s17, 512  ;;  %p838_p4 = scmp.lt.s32.totalorder %s1026_s17, %s1026_s17 }
  0x35   : > { %p831_p1 = scmp.ne.s32.totalorder %s1026_s17, %s830_s15  ;;  %p839_p7 = scmp.lt.s32.totalorder %s830_s15, %s830_s15 }
  0x37   : > { %p833_p2 = pnand %p831_p1, %p791_p0  ;;  %p840_p8 = por %p839_p7, %p838_p4 }
  0x39   : > { %p834_p3 = pneg %p833_p2 }
  0x3b   : > { %p841_p11 = pnand %p840_p8, %p834_p3 }
  0x3d   : > { %844 = shalt.err (!%p841_p11)
}
  0x3e   : > { %s919_s9 = smov 128   ;;  %s920_s14 = smov 8  }
  0x3f   : > { %740 = dma.hbm_to_vmem [thread:$0]  (!%p1022_p12), %s1166_s5, 512, %s1026_s17, [#allocation6], %s919_s9, %s919_s9, %s920_s14  }
  0x40   : > { %p1176_p13 = scmp.ne.s32.totalorder %s1174_s13, 0 }
  0x41   : > { %p1177_p0 = scmp.eq.s32.totalorder (!%p1176_p13), %s986_s28, 0 }
  0x42   : > { %263 = sbr.rel (%p1176_p13) target bundleno = 744 (0x2e8), region = 48 }
  0x49   : > { %890 = dma.done.wait (%p1177_p0), [#allocation3], 128   ;;  %p1178_p6 = pmov %p1177_p0 }
  0x4a   : > { %p1179_p5 = pmov %p1177_p0 }
  0x4b   : > { %892 = vsyncadd (%p1178_p6), [#allocation3], 4294967168 }
  0x4c   : > { %894 = dma.done.wait (%p1179_p5), [#allocation6], 512   ;;  %p1180_p9 = pmov %p1177_p0 }
  0x4d   : > { %p298_p10 = scmp.lt.s32.totalorder %s986_s28, 1  ;;  %v921_v0 = vmov 0.0   ;;  %vm922_vm0 = vmmov 0   ;;  %v923_v1 = vmov 0.0|0.0   ;;  %vm311_vm1 = vcmask 64512   ;;  %v303_v2 = vld [vmem:[#allocation2] sm:$0xff] }
  0x4e   : > { %896 = vsyncadd (%p1180_p9), [#allocation6], 4294966784  ;;  %685 = vmatprep.subr.mxu0 %v921_v0  ;;  %687 = vmatprep.mubr.msk.f32.mxu0 %vm922_vm0, %v921_v0  ;;  %v386_v4 = vld [vmem:[%s1164_s3] sm:$0xff]  ;;  %v387_v5 = vld [vmem:[%s1164_s3 + $0x8] sm:$0xff]  ;;  %vm397_vm2 = vcmask 261120   ;;  %s295_s20 = sand.u32 1, %s907_s25  }
  0x4f   : > { %s299_s13 = scalar_select %p298_p10, %s986_s28, 1  ;;  %712 = vmatprep.subr.bf16.mxu1 %v923_v1  ;;  %698 = vmatprep.mubr.msk.f32.mxu1 %vm922_vm0, %v921_v0  ;;  %v713_v6 = vpack.c.bf16 %v387_v5, %v386_v4  ;;  %v388_v7 = vld [vmem:[%s1164_s3 + $0x10] sm:$0xff]  ;;  %v389_v8 = vld [vmem:[%s1164_s3 + $0x18] sm:$0xff]  ;;  %v472_v10 = vld [vmem:[#allocation5] sm:$0xff]  ;;  %vm556_vm3 = vcmask 523264  }
  0x50   : > { %686 = vmatpush3.msra.mxu0 %v303_v2  ;;  %v716_v9 = vpack.c.bf16 %v389_v8, %v388_v7  ;;  %v473_v11 = vld [vmem:[#allocation5 + $0x8] sm:$0xff]  ;;  %v663_v13 = vld [vmem:[%s1163_s2] ss:$0 sm:$0xff]  ;;  %v474_v18 = vld [vmem:[#allocation5 + $0x10] sm:$0xff]  ;;  %s670_s29 = sshll.u32 %s986_s28, 7  ;;  %s559_s19 = scalar_lea.sflag [#allocation4], %s295_s20 }
  0x51   : > { %s662_s17 = sshll.u32 %s299_s13, 3  ;;  %718 = vmatprep.subr.bf16.mxu0 %v923_v1  ;;  %714 = vmatpush3.bf16.msra.mxu1 %v713_v6  ;;  %v719_v12 = vpack.c.bf16 %v473_v11, %v472_v10  ;;  %v475_v19 = vld [vmem:[#allocation5 + $0x18] sm:$0xff]  ;;  %s1119_s16 = scalar_lea.hbm %s1168_s7, %s670_s29 }
  0x52   : > { %s301_s21 = scalar_lea.vmem %s1161_s0, %s662_s17  ;;  %715 = vmatprep.subr.bf16.mxu1 %v923_v1  ;;  %v722_v20 = vpack.c.bf16 %v475_v19, %v474_v18  ;;  %v665_v21 = vld [vmem:[%s1165_s4] ss:$0 sm:$0xff]  ;;  %p1181_p1 = scmp.ne.s32.totalorder %s1172_s11, 0 }
  0x53   : > { %v302_v3 = vld [vmem:[%s301_s21] sm:$0xff]  ;;  %s661_s21 = sshll.u32 %s295_s20, 3  ;;  %s924_s28 = smov [#allocation7]  }
  0x54   : > { %688 = vmatmul.mubr.msk.f32.vlgmr.msra.gmra.mrb[0].mxu0 %vm311_vm1, %v302_v3  ;;  %v667_v26 = vld [vmem:[%s1167_s6] ss:$0 sm:$0xff]  ;;  %s297_s8 = scalar_lea.vmem [#allocation7], %s661_s21  ;;  %s849_s17 = sshll.u32 %s924_s28, 4  ;;  %s850_s17 = int_to_ptr.vmem [resolvable:$false] %s849_s17 }
  0x55   : > { %709 = vmatprep.mubr.msk.f32.mxu0 %vm922_vm0, %v921_v0  ;;  %717 = vmatpush3.bf16.msra.mxu1 %v716_v9  ;;  %s572_s15 = sshll.u32 %s297_s8, 4  ;;  %s851_s18 = scalar_lea.vmem %s850_s17, 256  ;;  %s1121_s15 = int_to_ptr.vmem [resolvable:$true] %s572_s15 }
  0x56   : > { %720 = vmatpush3.bf16.msra.mxu0 %v719_v12  ;;  %s845_s13 = scalar_lea.vmem %s1121_s15, 128  ;;  %p852_p4 = scmp.lt.s32.totalorder %s1121_s15, %s850_s17 }
  0x57   : > { %721 = vmatprep.subr.bf16.mxu0 %v923_v1  ;;  %p846_p12 = scmp.ne.s32.totalorder %s1121_s15, %s845_s13  ;;  %p853_p7 = scmp.lt.s32.totalorder %s851_s18, %s845_s13 }
  0x59   : > { %p847_p2 = pnand %p846_p12, %p1181_p1  ;;  %p854_p8 = por %p853_p7, %p852_p4 }
  0x5a   : > { %723 = vmatpush3.bf16.msra.mxu0 %v722_v20 }
  0x5b   : > { %p848_p3 = pneg %p847_p2 }
  0x5d   : > { %p855_p11 = pnand %p854_p8, %p848_p3 }
 0x127   : > { %v381_v14 = vpop.f32.mrb[0].mxu0 }
 0x128   : > { %v382_v15 = vadd.f32 %v663_v13, %v381_v14  ;;  %v689_v16 = vpop.f32.mrb[1].mxu0 }
 0x12a   : > { %v385_v17 = vmax.f32 %v382_v15, 0.0 }
 0x12c   : > { %699 = vmatmul.mubr.msk.f32.vlgmr.msra.gmra.mrb[0].mxu1 %vm397_vm2, %v385_v17 }
 0x1ff   : > { %v467_v22 = vpop.f32.mrb[0].mxu1 }
 0x200   : > { %v468_v23 = vadd.f32 %v665_v21, %v467_v22  ;;  %v700_v24 = vpop.f32.mrb[1].mxu1 }
 0x202   : > { %v471_v25 = vmax.f32 %v468_v23, 0.0 }
 0x204   : > { %710 = vmatmul.mubr.msk.f32.vlgmr.msra.gmra.mrb[2].mxu0 %vm397_vm2, %v471_v25 }
 0x2d7   : > { %v552_v27 = vpop.f32.mrb[2].mxu0 }
 0x2d8   : > { %v553_v28 = vadd.f32 %v667_v26, %v552_v27  ;;  %v711_v29 = vpop.f32.mrb[3].mxu0 }
 0x2da   : > { %557 = vst.msk [vmem:[%s297_s8] sm:$0xff] %vm556_vm3, %v553_v28 }
 0x2db   : > { %858 = shalt.err (!%p855_p11)
}
 0x2dc   : > { %s859_s20 = scalar_lea.hbm %s1119_s16, 128  ;;  %s863_s23 = scalar_lea.hbm %s1168_s7, 256 }
 0x2dd   : > { %p860_p13 = scmp.ne.s32.totalorder %s1119_s16, %s859_s20  ;;  %p864_p5 = scmp.lt.u32.totalorder %s1119_s16, %s1168_s7 }
 0x2de   : > { %p865_p9 = scmp.lt.u32.totalorder %s863_s23, %s859_s20  ;;  %p867_p12 = scmp.lt.u32.totalorder %s859_s20, %s1119_s16 }
 0x2df   : > { %p861_p0 = pnand %p860_p13, %p1181_p1 }
 0x2e0   : > { %p866_p10 = por %p865_p9, %p864_p5 }
 0x2e1   : > { %p862_p6 = pneg %p861_p0 }
 0x2e2   : > { %p868_p2 = por %p867_p12, %p866_p10 }
 0x2e4   : > { %p869_p3 = pnand %p868_p2, %p862_p6 }
 0x2e6   : > { %872 = shalt.err (!%p869_p3)
}
 0x2e7   : > { %732 = dma.vmem_to_hbm [thread:$0]  (%p1181_p1), %s1121_s15, 128, %s1119_s16, %s559_s19  }
 0x2e8 PF: > { %p749_p4 = scmp.ge.s32.totalorder %s915_s27, 2  ;;  %s584_s9 = sand.u32 1, %s903_s24  }
 0x2e9   : > { %p1182_p7 = scmp.ne.s32.totalorder %s1173_s12, 0  ;;  %s585_s14 = scalar_lea.sflag [#allocation4], %s584_s9 }
 0x2eb   : > { %p742_p8 = pnand %p749_p4, %p1182_p7 }
 0x2ed   : > { %898 = dma.done.wait (!%p742_p8), %s585_s14, 128  }
 0x2ee   : > { %900 = vsyncadd (!%p742_p8), %s585_s14, 4294967168  ;;  %p19_p11 = scmp.ge.s32.totalorder %s990_s30, 4   ;;  %s1183_s24 = smov %s907_s25 }
 0x2ef   : > { %s1184_s25 = smov %s911_s26  ;;  %s1185_s26 = smov %s1001_s10 }
 0x2f0   : > { %s1186_s27 = smov %s990_s30  ;;  %21 = sbr.rel (!%p19_p11) target bundleno = 5 (0x5), region = 92 }
 0x2f7   :  { %590 = vsyncpa [#allocation3], 1 }
 0x2f8   :  { %592 = vsyncpa [#allocation3 + $0x1], 1 }
 0x2f9   :  { %593 = vsyncpa [#allocation6], 1 }
 0x2fa   :  { %594 = vsyncpa [#allocation4], 1 }
 0x2fb   :  { %596 = vsyncpa [#allocation4 + $0x1], 1 }

</bundles_post_ra>
